<compile_context>
chip_gen: v6e
topology: v6e:2x2x1
jax: 0.10.0
libtpu: 0.0.40
codegen_flags: <defaults>
</compile_context>

<pallas_src>
import jax
import jax.numpy as jnp
from jax.experimental import pallas as pl
from jax.experimental.pallas import tpu as pltpu


# Parameter slab layout inside one (32, 128) f32 buffer (8-sublane-aligned):
#   W1 : [ 0:16,  0: 8]   hidden1 weight, rows 12:16 zero   (h1 = W1 @ x^T)
#   b1 : [ 0:16,  8: 9]   hidden1 bias column, rows 12:16 zero
#   W2 : [16:24,  0:16]   hidden2 weight, cols 12:16 zero
#   b2 : [16:24, 16:17]   hidden2 bias column
#   w3 : [24:32,  0: 1]   output weight column (8, 1)
#   b3 : [24:25,  8: 9]   output bias (1, 1)
SLAB_SHAPE = (32, 128)


def pima_kernel(x_ref, p_ref, o_ref):
    # x arrives batch-major straight from HBM (no wrapper transpose pass).
    # Cast to f32 here so bf16 inputs (half the input bytes) also work.
    x = x_ref[...].astype(jnp.float32)                    # (TB, 8)

    w1 = p_ref[0:16, 0:8]                                 # (16, 8), rows 12:16 zero
    b1 = p_ref[0:16, 8:9]                                 # (16, 1), rows 12:16 zero
    w2 = p_ref[16:24, 0:16]                               # (8, 16), cols 12:16 zero
    b2 = p_ref[16:24, 16:17]                              # (8, 1)
    w3 = p_ref[24:32, 0:1]                                # (8, 1)
    b3 = p_ref[24:25, 8:9]                                # (1, 1)

    # hidden1: Linear(8, 12) + ReLU.  A @ B^T form: contract the minor
    # (feature) dim of both operands so the MXU performs the batch-major ->
    # feature-major relayout and h1 comes out lane-dense as (16, TB).
    h1 = jax.lax.dot_general(w1, x, (((1,), (1,)), ((), ())),
                             preferred_element_type=jnp.float32) + b1
    h1 = jnp.maximum(h1, 0.0)                             # pad rows 12:16 stay 0

    # hidden2: Linear(12, 8) + ReLU   -> (8, TB)
    h2 = jnp.dot(w2, h1, preferred_element_type=jnp.float32) + b2
    h2 = jnp.maximum(h2, 0.0)

    # output: Linear(8, 1) + Sigmoid  -> (1, TB)
    # N=1 MXU matmul replaced by VPU multiply + sublane (XLU) reduce.
    y = jnp.sum(h2 * w3, axis=0, keepdims=True) + b3
    o_ref[...] = jax.nn.sigmoid(y)


def _round_up(a, m):
    return ((a + m - 1) // m) * m


def _cdiv(a, b):
    return (a + b - 1) // b


def pima_forward(x, slab, *, batch_tile=4096):
    """x: (B, 8) float32 or bfloat16. slab: (32, 128) packed params. Returns (B, 1) f32."""
    B = x.shape[0]
    assert x.shape[1] == 8, "PimaClassifier expects 8 input features"
    if x.dtype not in (jnp.float32, jnp.bfloat16):
        x = x.astype(jnp.float32)

    # ---- batch tiling: large lane-aligned tiles, >=2 grid steps when possible.
    TB = max(128, min(_round_up(batch_tile, 128), _round_up(B, 128)))
    n = _cdiv(B, TB)
    if n == 1 and B > 128:
        # Split so the second v7x TensorCore also gets a grid step.
        TB = _round_up(_cdiv(B, 2), 128)
        n = _cdiv(B, TB)
    if n > 1 and n % 2 == 1:
        # Prefer an even step count (v7x megacore) by shrinking TB slightly
        # instead of padding a whole extra tile of work.
        TB = _round_up(_cdiv(B, n + 1), 128)
        n = _cdiv(B, TB)
    Bp = n * TB

    if Bp != B:
        # Only hit when B is not a TB-multiple; TB-divisible batches take the
        # zero-copy path (no extra HBM pass over x).
        x = jnp.pad(x, ((0, Bp - B), (0, 0)))

    out = pl.pallas_call(
        pima_kernel,
        out_shape=jax.ShapeDtypeStruct((1, Bp), jnp.float32),
        grid=(n,),
        in_specs=[
            pl.BlockSpec((TB, 8), lambda i: (i, 0)),        # contiguous HBM reads
            pl.BlockSpec(SLAB_SHAPE, lambda i: (0, 0)),     # weights stay VMEM-resident
        ],
        out_specs=pl.BlockSpec((1, TB), lambda i: (0, i)),  # lane-dense output stores
        compiler_params=pltpu.CompilerParams(
            dimension_semantics=("parallel",)),             # v7x: both TensorCores
        cost_estimate=pl.CostEstimate(                      # help XLA overlap this call
            flops=400 * Bp,
            transcendentals=Bp,
            bytes_accessed=36 * Bp + 16384),
    )(x, slab)

    return out[0, :B].reshape(B, 1)                         # (B, 1)


def init_params(key):
    """PyTorch nn.Linear default init: U(-k, k), k = 1/sqrt(fan_in).

    Weights kept in PyTorch (out_features, in_features) layout."""
    ks = jax.random.split(key, 6)

    def linear(kw, kb, fan_in, fan_out):
        bound = 1.0 / jnp.sqrt(float(fan_in))
        w = jax.random.uniform(kw, (fan_out, fan_in), jnp.float32, -bound, bound)
        b = jax.random.uniform(kb, (fan_out,), jnp.float32, -bound, bound)
        return w, b

    w1, b1 = linear(ks[0], ks[1], 8, 12)
    w2, b2 = linear(ks[2], ks[3], 12, 8)
    w3, b3 = linear(ks[4], ks[5], 8, 1)
    return {"w1": w1, "b1": b1, "w2": w2, "b2": b2, "w3": w3, "b3": b3}


def pack_params(pt):
    """Pack all six PyTorch-layout params into one (32, 128) f32 slab (1 DMA),
    with 8-sublane-aligned bands (zero padding rows/cols are harmless: the
    padded h1 rows evaluate to relu(0) = 0 and meet zero W2 columns)."""
    slab = jnp.zeros(SLAB_SHAPE, jnp.float32)
    slab = slab.at[0:12, 0:8].set(pt["w1"])        # W1, rows 12:16 stay zero
    slab = slab.at[0:12, 8].set(pt["b1"])          # b1 column
    slab = slab.at[16:24, 0:12].set(pt["w2"])      # W2, cols 12:16 stay zero
    slab = slab.at[16:24, 16].set(pt["b2"])        # b2 column
    slab = slab.at[24:32, 0].set(pt["w3"][0, :])   # w3 column
    slab = slab.at[24, 8].set(pt["b3"][0])         # b3 scalar
    return slab


def reference_forward(x, pt):
    x = x.astype(jnp.float32)
    h1 = jnp.maximum(x @ pt["w1"].T + pt["b1"], 0.0)
    h2 = jnp.maximum(h1 @ pt["w2"].T + pt["b2"], 0.0)
    return jax.nn.sigmoid(h2 @ pt["w3"].T + pt["b3"])


if __name__ == "__main__":
    key = jax.random.PRNGKey(0)
    k_x, k_x2, k_p = jax.random.split(key, 3)

    pt = init_params(k_p)
    slab = pack_params(pt)

    # Small demo batch (single grid step).
    x = jax.random.normal(k_x, (8, 8), jnp.float32)
    out = jax.block_until_ready(pima_forward(x, slab))
    ref = reference_forward(x, pt)
    assert out.shape == (8, 1)
    assert jnp.allclose(out, ref, atol=1e-5, rtol=1e-5), "mismatch vs reference (B=8)"

    # Multi-step grid + padded (non-divisible) batch path: 2 grid steps of TB=256.
    x2 = jax.random.normal(k_x2, (300, 8), jnp.float32)
    out2 = jax.block_until_ready(pima_forward(x2, slab))
    ref2 = reference_forward(x2, pt)
    assert out2.shape == (300, 1)
    assert jnp.allclose(out2, ref2, atol=1e-5, rtol=1e-5), "mismatch vs reference (B=300)"

    print("KERNEL_OK")
</pallas_src>

<mosaic_0001>
module attributes {stable_mosaic.version = 11 : i64} {
  func.func @pima_kernel(%arg0: i32, %arg1: memref<128x8xf32, #tpu.memory_space<vmem>>, %arg2: memref<32x128xf32, #tpu.memory_space<vmem>>, %arg3: memref<1x128xf32, #tpu.memory_space<vmem>>) attributes {dimension_semantics = [#tpu.dimension_semantics<parallel>], iteration_bounds = array<i64: 1>, scalar_prefetch = 0 : i64, scratch_operands = 0 : i64, tpu.core_type = #tpu.core_type<tc>, window_params = [{transform_indices = @transform_0, window_bounds = array<i64: 128, 8>}, {pipeline_mode = #tpu.pipeline_mode<synchronous>, transform_indices = @transform_1, window_bounds = array<i64: 32, 128>}, {transform_indices = @transform_2, window_bounds = array<i64: 1, 128>}]} {
    %c0 = arith.constant 0 : index
    %c0_0 = arith.constant 0 : index
    %0 = vector.load %arg1[%c0, %c0_0] : memref<128x8xf32, #tpu.memory_space<vmem>>, vector<128x8xf32>
    %c0_1 = arith.constant 0 : index
    %c0_2 = arith.constant 0 : index
    %1 = vector.load %arg2[%c0_1, %c0_2] : memref<32x128xf32, #tpu.memory_space<vmem>>, vector<16x8xf32>
    %c0_3 = arith.constant 0 : index
    %c8 = arith.constant 8 : index
    %2 = vector.load %arg2[%c0_3, %c8] : memref<32x128xf32, #tpu.memory_space<vmem>>, vector<16x1xf32>
    %c16 = arith.constant 16 : index
    %c0_4 = arith.constant 0 : index
    %3 = vector.load %arg2[%c16, %c0_4] : memref<32x128xf32, #tpu.memory_space<vmem>>, vector<8x16xf32>
    %c16_5 = arith.constant 16 : index
    %c16_6 = arith.constant 16 : index
    %4 = vector.load %arg2[%c16_5, %c16_6] : memref<32x128xf32, #tpu.memory_space<vmem>>, vector<8x1xf32>
    %c24 = arith.constant 24 : index
    %c0_7 = arith.constant 0 : index
    %5 = vector.load %arg2[%c24, %c0_7] : memref<32x128xf32, #tpu.memory_space<vmem>>, vector<8x1xf32>
    %c24_8 = arith.constant 24 : index
    %c8_9 = arith.constant 8 : index
    %6 = vector.load %arg2[%c24_8, %c8_9] : memref<32x128xf32, #tpu.memory_space<vmem>>, vector<1x1xf32>
    %cst = arith.constant dense<0.000000e+00> : vector<16x128xf32>
    %7 = tpu.matmul %1, %0, %cst {dimension_numbers = #tpu.dot_dimension_numbers<[1], [1], [0], [0], [0, 0, 1, 0], [], []>} : vector<16x8xf32>, vector<128x8xf32>, vector<16x128xf32> -> vector<16x128xf32>
    %8 = vector.broadcast %2 : vector<16x1xf32> to vector<16x128xf32>
    %9 = arith.addf %7, %8 : vector<16x128xf32>
    %cst_10 = arith.constant 0.000000e+00 : f32
    %10 = vector.broadcast %cst_10 : f32 to vector<16x128xf32>
    %11 = arith.maximumf %9, %10 : vector<16x128xf32>
    %cst_11 = arith.constant dense<0.000000e+00> : vector<8x128xf32>
    %12 = tpu.matmul %3, %11, %cst_11 {dimension_numbers = #tpu.dot_dimension_numbers<[1], [0], [0], [1], [0, 0, 1, 1], [], []>} : vector<8x16xf32>, vector<16x128xf32>, vector<8x128xf32> -> vector<8x128xf32>
    %13 = vector.broadcast %4 : vector<8x1xf32> to vector<8x128xf32>
    %14 = arith.addf %12, %13 : vector<8x128xf32>
    %cst_12 = arith.constant 0.000000e+00 : f32
    %15 = vector.broadcast %cst_12 : f32 to vector<8x128xf32>
    %16 = arith.maximumf %14, %15 : vector<8x128xf32>
    %17 = vector.broadcast %5 : vector<8x1xf32> to vector<8x128xf32>
    %18 = arith.mulf %16, %17 : vector<8x128xf32>
    %cst_13 = arith.constant dense<0.000000e+00> : vector<128xf32>
    %19 = vector.multi_reduction <add>, %18, %cst_13 [0] : vector<8x128xf32> to vector<128xf32>
    %20 = vector.shape_cast %19 : vector<128xf32> to vector<1x128xf32>
    %21 = vector.broadcast %6 : vector<1x1xf32> to vector<1x128xf32>
    %22 = arith.addf %20, %21 : vector<1x128xf32>
    %23 = arith.negf %22 : vector<1x128xf32>
    %24 = math.exp %23 : vector<1x128xf32>
    %cst_14 = arith.constant 1.000000e+00 : f32
    %25 = vector.broadcast %cst_14 : f32 to vector<1x128xf32>
    %26 = arith.addf %25, %24 : vector<1x128xf32>
    %27 = arith.divf %25, %26 : vector<1x128xf32>
    %c0_15 = arith.constant 0 : index
    %c0_16 = arith.constant 0 : index
    %28 = vector.load %arg3[%c0_15, %c0_16] : memref<1x128xf32, #tpu.memory_space<vmem>>, vector<1x128xf32>
    tpu.vector_store %arg3[%c0_15, %c0_16], %27 {strides = array<i32>} : memref<1x128xf32, #tpu.memory_space<vmem>>, vector<1x128xf32>,
    return
  }
  func.func @transform_0(%arg0: i32) -> (i32, i32) {
    %c0_i32 = arith.constant 0 : i32
    %c0_i32_0 = arith.constant 0 : i32
    return %arg0, %c0_i32 : i32, i32
  }
  func.func @transform_1(%arg0: i32) -> (i32, i32) {
    %c0_i32 = arith.constant 0 : i32
    %c0_i32_0 = arith.constant 0 : i32
    %c0_i32_1 = arith.constant 0 : i32
    return %c0_i32, %c0_i32_0 : i32, i32
  }
  func.func @transform_2(%arg0: i32) -> (i32, i32) {
    %c0_i32 = arith.constant 0 : i32
    %c0_i32_0 = arith.constant 0 : i32
    return %c0_i32, %arg0 : i32, i32
  }
}

</mosaic_0001>

<bundles_post_ra>
// kernel: tpu_custom_call.1
= control target key start
LH: loop header
LB: loop body
LE: loop exit
PB: predicated region body
PF: predicated region fallthrough
CT: control target
= control target key end

     0   :  { %vm43_vm0 = vcmask 64512   ;;  %v409_v2 = vmov 8   ;;  %s530_s0 = inlined_call_operand.vmem [shape: f32[128,8], index: 0, kind: input, shape index: {}]   ;;  %s531_s1 = inlined_call_operand.vmem [shape: f32[32,128], index: 1, kind: input, shape index: {}]   ;;  %s532_s2 = inlined_call_operand.hbm [shape: f32[1,128], index: 2, kind: output, shape index: {}]  }
   0x1   :  { %v27_v0 = vld [vmem:[%s530_s0 + $0x78] sm:$0xff]  ;;  %v26_v1 = vld [vmem:[%s530_s0 + $0x70] sm:$0xff]  ;;  %380 = vset.pattern.permute.xlu0 %v409_v2  ;;  %v25_v3 = vld [vmem:[%s530_s0 + $0x68] sm:$0xff] }
   0x2   :  { %332 = vmatprep.subr.msk.mxu0 %vm43_vm0, %v27_v0  ;;  %v28_v4 = vld [vmem:[%s531_s1] sm:$0xff]  ;;  %v29_v5 = vld [vmem:[%s531_s1 + $0x8] sm:$0xff] }
   0x3   :  { %333 = vmatpush3.xpose.msk.msra.mxu0 %vm43_vm0, %v27_v0  ;;  %364 = vmatprep.mubr.msk.f32.mxu0 %vm43_vm0, %v28_v4 }
   0x4   :  { %334 = vmatprep.subr.msk.mxu0 %vm43_vm0, %v26_v1 }
   0x7   :  { %335 = vmatpush3.xpose.msk.msra.mxu0 %vm43_vm0, %v26_v1 }
   0x8   :  { %7 = vsyncpa [#allocation3], 0  ;;  %336 = vmatprep.subr.msk.mxu0 %vm43_vm0, %v25_v3  ;;  %40 = vperm.xlu0 %380, %v29_v5   ;;  %v24_v6 = vld [vmem:[%s530_s0 + $0x60] sm:$0xff]  ;;  %v23_v7 = vld [vmem:[%s530_s0 + $0x58] sm:$0xff]  ;;  %v410_v20 = vmov 0.0   ;;  %vm411_vm1 = vmmov 0  }
   0x9   :  { %v32_v8 = vld [vmem:[%s531_s1 + $0x18] sm:$0x1]  ;;  %v22_v9 = vld [vmem:[%s530_s0 + $0x50] sm:$0xff]  ;;  %v21_v10 = vld [vmem:[%s530_s0 + $0x48] sm:$0xff]  ;;  %367 = vmatprep.subr.mxu1 %v410_v20  ;;  %371 = vmatprep.mubr.msk.f32.mxu1 %vm411_vm1, %v410_v20  ;;  %v412_v22 = vmov 16   ;;  %v413_v24 = vmov 0  }
   0xa   :  { %v20_v11 = vld [vmem:[%s530_s0 + $0x40] sm:$0xff]  ;;  %v19_v12 = vld [vmem:[%s530_s0 + $0x38] sm:$0xff]  ;;  %v18_v13 = vld [vmem:[%s530_s0 + $0x30] sm:$0xff]  ;;  %381 = vset.pattern.permute.xlu1 %v412_v22  ;;  %vm178_vm2 = vcmask 130048  }
   0xb   :  { %337 = vmatpush3.xpose.msk.msra.mxu0 %vm43_vm0, %v25_v3  ;;  %v17_v14 = vld [vmem:[%s530_s0 + $0x28] sm:$0xff]  ;;  %v16_v15 = vld [vmem:[%s530_s0 + $0x20] sm:$0xff]  ;;  %v15_v16 = vld [vmem:[%s530_s0 + $0x18] sm:$0xff] }
   0xc   :  { %338 = vmatprep.subr.msk.mxu0 %vm43_vm0, %v24_v6  ;;  %35 = vperm.xlu0 %380, %v28_v4   ;;  %v14_v17 = vld [vmem:[%s530_s0 + $0x10] sm:$0xff]  ;;  %v13_v18 = vld [vmem:[%s530_s0 + $0x8] sm:$0xff]  ;;  %v12_v19 = vld [vmem:[%s530_s0] sm:$0xff] }
   0xd   :  { %v30_v21 = vld [vmem:[%s531_s1 + $0x10] sm:$0xff]  ;;  %v31_v23 = vld [vmem:[%s531_s1 + $0x18] sm:$0xff]  ;;  %s414_s1 = smov [#allocation2]  }
   0xe   :  { %175 = vperm.xlu1 %381, %v30_v21   ;;  %s283_s22 = sshll.u32 %s414_s1, 4  ;;  %s284_s22 = int_to_ptr.vmem [resolvable:$true] %s283_s22 }
   0xf   :  { %339 = vmatpush3.xpose.msk.msra.mxu0 %vm43_vm0, %v24_v6  ;;  %s387_s23 = scalar_lea.vmem %s284_s22, 16  ;;  %s391_s24 = scalar_lea.vmem %s284_s22, 32 }
  0x10   :  { %340 = vmatprep.subr.msk.mxu0 %vm43_vm0, %v23_v7  ;;  %266 = vperm.xlu0 %380, %v32_v8   ;;  %p388_p0 = scmp.ne.s32.totalorder %s284_s22, %s387_s23  ;;  %p392_p1 = scmp.lt.s32.totalorder %s284_s22, %s284_s22 }
  0x11   :  { %p393_p2 = scmp.lt.s32.totalorder %s391_s24, %s387_s23 }
  0x12   :  { %382 = vset.pattern.permute.xlu1 %v413_v24 }
  0x13   :  { %341 = vmatpush3.xpose.msk.msra.mxu0 %vm43_vm0, %v23_v7  ;;  %254 = vperm.xlu1 %382, %v31_v23   ;;  %p394_p3 = por %p393_p2, %p392_p1 }
  0x14   :  { %342 = vmatprep.subr.msk.mxu0 %vm43_vm0, %v22_v9 }
  0x15   :  { %p395_p4 = pnand %p394_p3, %p388_p0 }
  0x17   :  { %343 = vmatpush3.xpose.msk.msra.mxu0 %vm43_vm0, %v22_v9 }
  0x18   :  { %344 = vmatprep.subr.msk.mxu0 %vm43_vm0, %v21_v10 }
  0x1b   :  { %345 = vmatpush3.xpose.msk.msra.mxu0 %vm43_vm0, %v21_v10 }
  0x1c   :  { %346 = vmatprep.subr.msk.mxu0 %vm43_vm0, %v20_v11 }
  0x1f   :  { %347 = vmatpush3.xpose.msk.msra.mxu0 %vm43_vm0, %v20_v11 }
  0x20   :  { %348 = vmatprep.subr.msk.mxu0 %vm43_vm0, %v19_v12 }
  0x23   :  { %349 = vmatpush3.xpose.msk.msra.mxu0 %vm43_vm0, %v19_v12 }
  0x24   :  { %350 = vmatprep.subr.msk.mxu0 %vm43_vm0, %v18_v13 }
  0x27   :  { %351 = vmatpush3.xpose.msk.msra.mxu0 %vm43_vm0, %v18_v13 }
  0x28   :  { %352 = vmatprep.subr.msk.mxu0 %vm43_vm0, %v17_v14 }
  0x2b   :  { %353 = vmatpush3.xpose.msk.msra.mxu0 %vm43_vm0, %v17_v14 }
  0x2c   :  { %354 = vmatprep.subr.msk.mxu0 %vm43_vm0, %v16_v15 }
  0x2f   :  { %355 = vmatpush3.xpose.msk.msra.mxu0 %vm43_vm0, %v16_v15 }
  0x30   :  { %356 = vmatprep.subr.msk.mxu0 %vm43_vm0, %v15_v16 }
  0x33   :  { %357 = vmatpush3.xpose.msk.msra.mxu0 %vm43_vm0, %v15_v16 }
  0x34   :  { %358 = vmatprep.subr.msk.mxu0 %vm43_vm0, %v14_v17 }
  0x37   :  { %359 = vmatpush3.xpose.msk.msra.mxu0 %vm43_vm0, %v14_v17 }
  0x38   :  { %360 = vmatprep.subr.msk.mxu0 %vm43_vm0, %v13_v18 }
  0x3b   :  { %361 = vmatpush3.xpose.msk.msra.mxu0 %vm43_vm0, %v13_v18 }
  0x3c   :  { %362 = vmatprep.subr.msk.mxu0 %vm43_vm0, %v12_v19 }
  0x3f   :  { %363 = vmatpush3.xpose.msk.msra.mxu0 %vm43_vm0, %v12_v19 }
  0x42   :  { %365 = vmatmul.mubr.msk.f32.vlgmr.msra.gmra.mxu0 %vm43_vm0, %v29_v5 }
  0x83   :  { %v41_v25 = vpop.permute.xlu0 %40 }
  0x87   :  { %v36_v28 = vpop.permute.xlu0 %35 }
  0x89   :  { %v176_v33 = vpop.permute.xlu1 %175 }
  0x8b   :  { %v267_v46 = vpop.permute.xlu0 %266 }
  0x8e   :  { %v255_v37 = vpop.permute.xlu1 %254 }
 0x102   :  { %v366_v26 = vpop.f32.mrf.mxu0 }
 0x103   :  { %v168_v27 = vadd.f32 %v366_v26, %v41_v25 }
 0x104   :  { %v162_v29 = vpop.f32.mrf.mxu0 }
 0x105   :  { %v172_v30 = vmax.f32 %v168_v27, 0.0  ;;  %v163_v31 = vadd.f32 %v162_v29, %v36_v28 }
 0x107   :  { %v171_v32 = vmax.f32 %v163_v31, 0.0  ;;  %368 = vmatpush3.msra.mxu1 %v172_v30 }
 0x108   :  { %369 = vmatprep.subr.mxu1 %v410_v20 }
 0x109   :  { %370 = vmatpush3.msra.mxu1 %v171_v32 }
 0x10a   :  { %372 = vmatmul.mubr.msk.f32.vlgmr.msra.gmra.mxu1 %vm178_vm2, %v30_v21 }
 0x1ca   :  { %v247_v34 = vpop.f32.mrf.mxu1 }
 0x1cb   :  { %v248_v35 = vadd.f32 %v247_v34, %v176_v33 }
 0x1cc   :  { %v373_v36 = vpop.f32.mrf.mxu1 }
 0x1cd   :  { %v251_v38 = vmax.f32 %v248_v35, 0.0 }
 0x1cf   :  { %v257_v39 = vmul.f32 %v255_v37, %v251_v38 }
 0x1d1   :  { %v258_v40 = vrot.slane %v257_v39, 4 }
 0x1d3   :  { %v259_v41 = vadd.f32 %v258_v40, %v257_v39 }
 0x1d5   :  { %v260_v42 = vrot.slane %v259_v41, 2 }
 0x1d7   :  { %v261_v43 = vadd.f32 %v260_v42, %v259_v41 }
 0x1d9   :  { %v262_v44 = vrot.slane %v261_v43, 1 }
 0x1db   :  { %v263_v45 = vadd.f32 %v262_v44, %v261_v43 }
 0x1dd   :  { %v269_v47 = vadd.f32 %v267_v46, %v263_v45 }
 0x1df   :  { %v310_v48 = vmul.f32 -1.442695, %v269_v47 }
 0x1e1   :  { %383 = vpow2.f32 %v310_v48 }
 0x1ee   :  { %v384_v49 = vpop.eup %383 }
 0x1ef   :  { %v273_v50 = vadd.f32 1.0, %v384_v49 }
 0x1f1   :  { %385 = vrcp.f32 %v273_v50 }
 0x1fe   :  { %v386_v51 = vpop.eup %385 }
 0x1ff   :  { %276 = vst [vmem:[#allocation2] sm:$0x1] %v386_v51 }
 0x200   :  { %398 = shalt.err (!%p395_p4)
}
 0x201   :  { %286 = dma.vmem_to_hbm [thread:$0]  %s284_s22, 16, %s532_s2, [#allocation3]  }
 0x202   :  { %407 = dma.done.wait [#allocation3], 16  }
 0x203   :  { %408 = vsyncadd [#allocation3], 4294967280 }
 0x204   :  { %290 = vsyncpa [#allocation3], 1 }

</bundles_post_ra>
